<compile_context>
chip_gen: v5e
topology: v5e:2x2
jax: 0.10.0
libtpu: 0.0.40
codegen_flags: <defaults>
</compile_context>

<pallas_src>
import functools

import jax
import jax.numpy as jnp
from jax.experimental import pallas as pl
from jax.experimental.pallas import tpu as pltpu

_LANE = 128


def _vmem_limit(block_f32_bytes):
    # Headroom for double-buffered in/out blocks at native dtype plus the f32
    # temporaries of the stats / normalize pass.  Capped well under the 64 MiB
    # physical VMEM of a v7x TensorCore.
    need = 8 * block_f32_bytes + (1 << 20)
    return int(min(48 * 1024 * 1024, max(32 * 1024 * 1024, need)))


def _pick_chunk_hw(hw, c, target_bytes):
    """Largest divisor of hw that is a multiple of 128 and fits target_bytes (f32)."""
    max_chunk = max(1, target_bytes // (c * 4))
    if max_chunk >= hw:
        return hw
    for cand in range(int(max_chunk), 0, -1):
        if hw % cand == 0 and cand % _LANE == 0:
            return cand
    # No lane-dense divisor small enough -> caller falls back to the fused path.
    return hw


# --------------------------------------------------------------------------
# Path A: one batch element per grid step, fused stats + normalize.
# --------------------------------------------------------------------------
def _gln_fused_kernel(x_ref, w_ref, b_ref, o_ref, *, eps, inv_count):
    # x_ref: (1, C, HW) block for one batch element (full C, HW extent).
    x = x_ref[...].astype(jnp.float32)

    # One traversal for the stats: sum and sum-of-squares.
    mean = jnp.sum(x) * inv_count
    mean_sq = jnp.sum(x * x) * inv_count
    var = jnp.maximum(mean_sq - mean * mean, 0.0)
    inv_std = jax.lax.rsqrt(var + eps)          # EUP, not a VPU divide

    # Fold affine params into per-channel scale/shift (w, b are f32 (1, C, 1)).
    w = w_ref[...]
    b = b_ref[...]
    scale = w * inv_std                          # (1, C, 1)
    shift = b - mean * scale                     # (1, C, 1)

    # Normalize pass: one mul + one add per element.
    o_ref[...] = (x * scale + shift).astype(o_ref.dtype)


# --------------------------------------------------------------------------
# Path B (chunked, v7x-friendly): phase 1 = per-batch stats over HW chunks.
# --------------------------------------------------------------------------
def _gln_stats_kernel(x_ref, mean_ref, istd_ref, sum_ref, ssq_ref, *, eps, inv_count):
    c = pl.program_id(1)

    @pl.when(c == 0)
    def _():
        sum_ref[...] = jnp.zeros_like(sum_ref)
        ssq_ref[...] = jnp.zeros_like(ssq_ref)

    x = x_ref[...].astype(jnp.float32)
    sum_ref[...] += jnp.sum(x)
    ssq_ref[...] += jnp.sum(x * x)

    @pl.when(c == pl.num_programs(1) - 1)
    def _():
        s = sum_ref[...] * inv_count             # (1, 1) mean
        q = ssq_ref[...] * inv_count             # (1, 1) E[x^2]
        var = jnp.maximum(q - s * s, 0.0)
        mean_ref[...] = s.reshape(1, 1, 1)
        istd_ref[...] = jax.lax.rsqrt(var + eps).reshape(1, 1, 1)


# Phase 2: lane-dense normalize with precomputed per-(batch, channel) scale/shift.
def _gln_apply_kernel(x_ref, s_ref, t_ref, o_ref):
    x = x_ref[...].astype(jnp.float32)
    o_ref[...] = (x * s_ref[...] + t_ref[...]).astype(o_ref.dtype)


# --------------------------------------------------------------------------
# Wrapper
# --------------------------------------------------------------------------
def global_layer_norm(x, weight, bias, eps=1e-8, *,
                      max_block_bytes=4 * 1024 * 1024,
                      chunk_bytes=2 * 1024 * 1024):
    """gLN forward.  x: (N, C, H, W) or (N, C, L).  weight/bias: (C, 1[, 1])."""
    orig_shape = x.shape
    if x.ndim == 4:
        N, C, H, W = x.shape
        L = H * W
    elif x.ndim == 3:
        N, C, L = x.shape
    else:
        raise ValueError("global_layer_norm expects a 3-D or 4-D input")

    x3 = x.reshape(N, C, L)
    w3 = weight.reshape(1, C, 1).astype(jnp.float32)
    b3 = bias.reshape(1, C, 1).astype(jnp.float32)
    inv_count = 1.0 / float(C * L)
    block_f32 = C * L * 4

    chunk = L
    if block_f32 > max_block_bytes:
        chunk = _pick_chunk_hw(L, C, chunk_bytes)

    if chunk == L:
        # -------- Path A: fused single-block path (one batch element / step).
        out = pl.pallas_call(
            functools.partial(_gln_fused_kernel, eps=float(eps), inv_count=inv_count),
            out_shape=jax.ShapeDtypeStruct((N, C, L), x.dtype),
            grid_spec=pltpu.PrefetchScalarGridSpec(
                num_scalar_prefetch=0,
                grid=(N,),
                in_specs=[
                    pl.BlockSpec((1, C, L), lambda n: (n, 0, 0)),
                    pl.BlockSpec((1, C, 1), lambda n: (0, 0, 0)),  # grid-invariant
                    pl.BlockSpec((1, C, 1), lambda n: (0, 0, 0)),
                ],
                out_specs=pl.BlockSpec((1, C, L), lambda n: (n, 0, 0)),
            ),
            compiler_params=pltpu.CompilerParams(
                dimension_semantics=("parallel",),
                vmem_limit_bytes=_vmem_limit(block_f32),
            ),
        )(x3, w3, b3)
        return out.reshape(orig_shape)

    # -------- Path B: chunked two-phase path (small tiles, fits v7x VMEM).
    n_chunks = L // chunk
    chunk_f32 = C * chunk * 4

    mean, istd = pl.pallas_call(
        functools.partial(_gln_stats_kernel, eps=float(eps), inv_count=inv_count),
        out_shape=(jax.ShapeDtypeStruct((N, 1, 1), jnp.float32),
                   jax.ShapeDtypeStruct((N, 1, 1), jnp.float32)),
        grid_spec=pltpu.PrefetchScalarGridSpec(
            num_scalar_prefetch=0,
            grid=(N, n_chunks),                      # reduction axis last
            in_specs=[pl.BlockSpec((1, C, chunk), lambda n, c: (n, 0, c))],
            out_specs=(pl.BlockSpec((1, 1, 1), lambda n, c: (n, 0, 0)),
                       pl.BlockSpec((1, 1, 1), lambda n, c: (n, 0, 0))),
            scratch_shapes=[pltpu.VMEM((1, 1), jnp.float32),
                            pltpu.VMEM((1, 1), jnp.float32)],
        ),
        compiler_params=pltpu.CompilerParams(
            dimension_semantics=("parallel", "arbitrary"),
            vmem_limit_bytes=_vmem_limit(chunk_f32),
        ),
    )(x3)

    # Fold weight/bias + stats into per-(batch, channel) scale & shift
    # (tiny N*C work, done once in XLA between the two calls).
    scale = w3 * istd                # (N, C, 1)
    shift = b3 - mean * scale        # (N, C, 1)

    out = pl.pallas_call(
        _gln_apply_kernel,
        out_shape=jax.ShapeDtypeStruct((N, C, L), x.dtype),
        grid_spec=pltpu.PrefetchScalarGridSpec(
            num_scalar_prefetch=0,
            grid=(N, n_chunks),
            in_specs=[
                pl.BlockSpec((1, C, chunk), lambda n, c: (n, 0, c)),
                pl.BlockSpec((1, C, 1), lambda n, c: (n, 0, 0)),
                pl.BlockSpec((1, C, 1), lambda n, c: (n, 0, 0)),
            ],
            out_specs=pl.BlockSpec((1, C, chunk), lambda n, c: (n, 0, c)),
        ),
        compiler_params=pltpu.CompilerParams(
            dimension_semantics=("parallel", "parallel"),
            vmem_limit_bytes=_vmem_limit(chunk_f32),
        ),
    )(x3, scale, shift)
    return out.reshape(orig_shape)


def _reference(x, weight, bias, eps=1e-8):
    mean = jnp.mean(x, axis=(1, 2, 3), keepdims=True)
    var = jnp.mean((x - mean) ** 2, axis=(1, 2, 3), keepdims=True)
    return weight[None] * (x - mean) / jnp.sqrt(var + eps) + bias[None]


if __name__ == "__main__":
    key = jax.random.PRNGKey(0)
    N, C, H, W = 2, 4, 16, 16

    x = jax.random.normal(key, (N, C, H, W), dtype=jnp.float32)

    # Deterministic parameter init, matching nn.Parameter(torch.ones/zeros(dim,1,1)).
    weight = jnp.ones((C, 1, 1), dtype=jnp.float32)
    bias = jnp.zeros((C, 1, 1), dtype=jnp.float32)

    y_ref = _reference(x, weight, bias, eps=1e-8)

    # Fused single-block path (the one real shapes of this size take).
    y = global_layer_norm(x, weight, bias, eps=1e-8)
    y = jax.block_until_ready(y)
    assert y.shape == x.shape
    assert jnp.allclose(y, y_ref, atol=1e-5, rtol=1e-5), "fused path mismatch"

    # Force the chunked two-phase (v7x-friendly) path on the same input to
    # exercise it as well: 2 chunks of 128 lanes.
    y2 = global_layer_norm(x, weight, bias, eps=1e-8,
                           max_block_bytes=1024, chunk_bytes=2048)
    y2 = jax.block_until_ready(y2)
    assert jnp.allclose(y2, y_ref, atol=1e-5, rtol=1e-5), "chunked path mismatch"

    print("KERNEL_OK")
</pallas_src>

<mosaic_0001>
module attributes {stable_mosaic.version = 11 : i64} {
  func.func @_gln_fused_kernel(%arg0: i32, %arg1: memref<1x4x256xf32, #tpu.memory_space<vmem>>, %arg2: memref<1x4x1xf32, #tpu.memory_space<vmem>>, %arg3: memref<1x4x1xf32, #tpu.memory_space<vmem>>, %arg4: memref<1x4x256xf32, #tpu.memory_space<vmem>>) attributes {dimension_semantics = [#tpu.dimension_semantics<parallel>], iteration_bounds = array<i64: 2>, scalar_prefetch = 0 : i64, scratch_operands = 0 : i64, tpu.core_type = #tpu.core_type<tc>, window_params = [{transform_indices = @transform_0, window_bounds = array<i64: 1, 4, 256>}, {pipeline_mode = #tpu.pipeline_mode<synchronous>, transform_indices = @transform_1, window_bounds = array<i64: 1, 4, 1>}, {pipeline_mode = #tpu.pipeline_mode<synchronous>, transform_indices = @transform_2, window_bounds = array<i64: 1, 4, 1>}, {transform_indices = @transform_3, window_bounds = array<i64: 1, 4, 256>}]} {
    %c0 = arith.constant 0 : index
    %c0_0 = arith.constant 0 : index
    %c0_1 = arith.constant 0 : index
    %0 = vector.load %arg1[%c0, %c0_0, %c0_1] : memref<1x4x256xf32, #tpu.memory_space<vmem>>, vector<1x4x256xf32>
    %1 = vector.shape_cast %0 : vector<1x4x256xf32> to vector<1x1x4x256xf32>
    %cst = arith.constant dense<0.000000e+00> : vector<1xf32>
    %2 = vector.multi_reduction <add>, %1, %cst [1, 2, 3] : vector<1x1x4x256xf32> to vector<1xf32>
    %3 = vector.shape_cast %2 : vector<1xf32> to vector<1x1x1x1xf32>
    %4 = vector.extract %3[0, 0, 0, 0] : f32 from vector<1x1x1x1xf32>
    %cst_2 = arith.constant 9.765625E-4 : f32
    %5 = arith.mulf %4, %cst_2 : f32
    %6 = arith.mulf %0, %0 : vector<1x4x256xf32>
    %7 = vector.shape_cast %6 : vector<1x4x256xf32> to vector<1x1x4x256xf32>
    %cst_3 = arith.constant dense<0.000000e+00> : vector<1xf32>
    %8 = vector.multi_reduction <add>, %7, %cst_3 [1, 2, 3] : vector<1x1x4x256xf32> to vector<1xf32>
    %9 = vector.shape_cast %8 : vector<1xf32> to vector<1x1x1x1xf32>
    %10 = vector.extract %9[0, 0, 0, 0] : f32 from vector<1x1x1x1xf32>
    %cst_4 = arith.constant 9.765625E-4 : f32
    %11 = arith.mulf %10, %cst_4 : f32
    %12 = arith.mulf %5, %5 : f32
    %13 = arith.subf %11, %12 : f32
    %cst_5 = arith.constant 0.000000e+00 : f32
    %14 = arith.maximumf %13, %cst_5 : f32
    %cst_6 = arith.constant 9.99999993E-9 : f32
    %15 = arith.addf %14, %cst_6 : f32
    %16 = math.rsqrt %15 : f32
    %c0_7 = arith.constant 0 : index
    %c0_8 = arith.constant 0 : index
    %c0_9 = arith.constant 0 : index
    %17 = vector.load %arg2[%c0_7, %c0_8, %c0_9] : memref<1x4x1xf32, #tpu.memory_space<vmem>>, vector<1x4x1xf32>
    %c0_10 = arith.constant 0 : index
    %c0_11 = arith.constant 0 : index
    %c0_12 = arith.constant 0 : index
    %18 = vector.load %arg3[%c0_10, %c0_11, %c0_12] : memref<1x4x1xf32, #tpu.memory_space<vmem>>, vector<1x4x1xf32>
    %19 = vector.broadcast %16 : f32 to vector<1x4x1xf32>
    %20 = arith.mulf %17, %19 : vector<1x4x1xf32>
    %21 = vector.broadcast %5 : f32 to vector<1x4x1xf32>
    %22 = arith.mulf %21, %20 : vector<1x4x1xf32>
    %23 = arith.subf %18, %22 : vector<1x4x1xf32>
    %24 = vector.broadcast %20 : vector<1x4x1xf32> to vector<1x4x256xf32>
    %25 = arith.mulf %0, %24 : vector<1x4x256xf32>
    %26 = vector.broadcast %23 : vector<1x4x1xf32> to vector<1x4x256xf32>
    %27 = arith.addf %25, %26 : vector<1x4x256xf32>
    %c0_13 = arith.constant 0 : index
    %c0_14 = arith.constant 0 : index
    %c0_15 = arith.constant 0 : index
    %28 = vector.load %arg4[%c0_13, %c0_14, %c0_15] : memref<1x4x256xf32, #tpu.memory_space<vmem>>, vector<1x4x256xf32>
    tpu.vector_store %arg4[%c0_13, %c0_14, %c0_15], %27 {strides = array<i32>} : memref<1x4x256xf32, #tpu.memory_space<vmem>>, vector<1x4x256xf32>,
    return
  }
  func.func @transform_0(%arg0: i32) -> (i32, i32, i32) {
    %c0_i32 = arith.constant 0 : i32
    %c0_i32_0 = arith.constant 0 : i32
    %c0_i32_1 = arith.constant 0 : i32
    return %arg0, %c0_i32, %c0_i32_0 : i32, i32, i32
  }
  func.func @transform_1(%arg0: i32) -> (i32, i32, i32) {
    %c0_i32 = arith.constant 0 : i32
    %c0_i32_0 = arith.constant 0 : i32
    %c0_i32_1 = arith.constant 0 : i32
    %c0_i32_2 = arith.constant 0 : i32
    return %c0_i32, %c0_i32_0, %c0_i32_1 : i32, i32, i32
  }
  func.func @transform_2(%arg0: i32) -> (i32, i32, i32) {
    %c0_i32 = arith.constant 0 : i32
    %c0_i32_0 = arith.constant 0 : i32
    %c0_i32_1 = arith.constant 0 : i32
    %c0_i32_2 = arith.constant 0 : i32
    return %c0_i32, %c0_i32_0, %c0_i32_1 : i32, i32, i32
  }
  func.func @transform_3(%arg0: i32) -> (i32, i32, i32) {
    %c0_i32 = arith.constant 0 : i32
    %c0_i32_0 = arith.constant 0 : i32
    %c0_i32_1 = arith.constant 0 : i32
    return %arg0, %c0_i32, %c0_i32_0 : i32, i32, i32
  }
}

</mosaic_0001>

<bundles_post_ra>
// kernel: tpu_custom_call.1
= control target key start
LH: loop header
LB: loop body
LE: loop exit
PB: predicated region body
PF: predicated region fallthrough
CT: control target
= control target key end

     0   :  { %8 = vsyncpa [#allocation3], 0  ;;  %s700_s0 = inlined_call_operand.hbm [shape: f32[2,4,256], index: 0, kind: input, shape index: {}]   ;;  %s701_s1 = inlined_call_operand.vmem [shape: f32[1,4,1], index: 1, kind: input, shape index: {}]   ;;  %s702_s2 = inlined_call_operand.vmem [shape: f32[1,4,1], index: 2, kind: input, shape index: {}]   ;;  %s703_s3 = inlined_call_operand.hbm [shape: f32[2,4,256], index: 3, kind: output, shape index: {}]  }
   0x1   :  { %10 = vsyncpa [#allocation3 + $0x1], 0 }
   0x2   :  { %11 = vsyncpa [#allocation4], 0 }
   0x3   :  { %13 = vsyncpa [#allocation4 + $0x1], 0  ;;  %s557_s12 = smov 0   ;;  %s559_s13 = smov 0  }
   0x4   :  { %s561_s14 = smov 0   ;;  %s563_s15 = smov 0  }
   0x5 LB: > { %s578_s16 = sadd.s32 4294967295, %s532_s15   ;;  %s361_s17 = sadd.s32 4294967294, %s532_s15   ;;  %s532_s15 = sphi %s563_s15, %s713_s15   ;;  %s528_s14 = sphi %s561_s14, %s712_s14   ;;  %s524_s13 = sphi %s559_s13, %s711_s13   ;;  %s520_s12 = sphi %s557_s12, %s710_s12  }
   0x6   : > { %s582_s18 = sadd.s32 1, %s532_s15   ;;  %s26_s19 = sadd.s32 1, %s528_s14 }
   0x7   : > { %s23_s20 = ssub.s32 %s532_s15, %s582_s18  ;;  %p33_p0 = scmp.ne.s32.totalorder %s528_s14, %s524_s13 }
   0x8   : > { %p24_p1 = scmp.eq.s32.totalorder %s23_s20, 0  ;;  %p34_p2 = scmp.eq.s32.totalorder %s532_s15, 0 }
   0x9   : > { %p39_p3 = scmp.ne.s32.totalorder %s524_s13, %s520_s12  ;;  %p40_p4 = scmp.eq.s32.totalorder %s578_s16, 0 }
   0xa   : > { %s594_s21 = scalar_select %p24_p1, %s528_s14, %s26_s19  }
   0xb   : > { %p596_p5 = por %p34_p2, %p33_p0  ;;  %p600_p6 = por %p40_p4, %p39_p3 }
   0xc   : > { %p105_p7 = scmp.eq.s32.totalorder %s578_s16, 1  ;;  %p111_p8 = scmp.eq.s32.totalorder %s361_s17, 1 }
   0xd   : > { %p395_p10 = scmp.lt.s32.totalorder %s532_s15, 2  ;;  %s137_s26 = sand.u32 1, %s528_s14  }
   0xe   : > { %p607_p11 = por %p105_p7, %p33_p0  ;;  %p611_p12 = por %p111_p8, %p39_p3 }
   0xf   : > { %s375_s27 = sshll.u32 %s532_s15, 3  ;;  %s364_s28 = sshll.u32 %s137_s26, 3 }
  0x10   : > { %s146_s4 = scalar_lea.hbm %s700_s0, %s375_s27  ;;  %s141_s6 = scalar_lea.vmem [#allocation2], %s364_s28 }
  0x11   : > { %s148_s5 = sshll.u32 %s146_s4, 4  ;;  %s150_s7 = sshll.u32 %s141_s6, 4  ;;  %s149_s5 = int_to_ptr.hbm [resolvable:$true] %s148_s5  ;;  %s151_s7 = int_to_ptr.vmem [resolvable:$true] %s150_s7 }
  0x12   : > { %p622_p13 = pnand %p395_p10, %p596_p5  ;;  %p367_p0 = scmp.ge.s32.totalorder %s532_s15, 1 }
  0x13   : > { %p155_p1 = scmp.lt.s32.totalorder %s532_s15, 3  ;;  %s138_s9 = scalar_lea.sflag [#allocation3], %s137_s26 }
  0x14   : > { %s436_s10 = sshra.s32 %s149_s5, 4  ;;  %p440_p3 = pneg %p622_p13  ;;  %s437_s10 = int_to_ptr.hbm [resolvable:$true] %s436_s10 }
  0x15   : > { %s438_s11 = scalar_lea.hbm %s437_s10, 8  ;;  %s443_s20 = scalar_lea.hbm %s700_s0, 16 }
  0x16   : > { %p439_p2 = scmp.ne.s32.totalorder %s437_s10, %s438_s11  ;;  %p444_p5 = scmp.lt.s32.totalorder %s437_s10, %s700_s0 }
  0x17   : > { %p445_p8 = scmp.lt.s32.totalorder %s443_s20, %s438_s11 }
  0x18   : > { %p441_p4 = pnand %p440_p3, %p439_p2 }
  0x19   : > { %p446_p10 = por %p445_p8, %p444_p5 }
  0x1a   : > { %p442_p7 = pneg %p441_p4 }
  0x1c   : > { %p447_p9 = pnand %p446_p10, %p442_p7 }
  0x1e   : > { %450 = shalt.err (!%p447_p9)
}
  0x1f   : > { %390 = dma.hbm_to_vmem [thread:$0]  (!%p622_p13), %s149_s5, 128, %s151_s7, %s138_s9  }
  0x20   : > { %p156_p2 = pnand %p367_p0, %p155_p1 }
  0x21   : > { %s643_s26 = sand.u32 (!%p156_p2), 1, %s524_s13  }
  0x22   : > { %159 = sbr.rel (%p156_p2) target bundleno = 447 (0x1bf), region = 32  ;;  %s368_s28 = sshll.u32 (!%p156_p2), %s643_s26, 3 }
  0x23   : > { %s162_s29 = scalar_lea.sflag (!%p156_p2), [#allocation3], %s643_s26  ;;  %s165_s30 = scalar_lea.vmem (!%p156_p2), [#allocation2], %s368_s28 }
  0x27   : > { %511 = dma.done.wait (%p600_p6), %s162_s29, 128  }
  0x28   : > { %513 = vsyncadd (%p600_p6), %s162_s29, 4294967168  ;;  %v653_v0 = vld [vmem:[%s165_s30] sm:$0xff]  ;;  %vm196_vm0 = vcmask 1043456   ;;  %s534_s9 = smov 0.0   ;;  %v535_v34 = vmov 0   ;;  %s376_s29 = sshll.u32 %s578_s16, 3 }
  0x29   : > { %191 = vst [vmem:[#allocation1] ss:$2 sm:$0xff] %v653_v0  ;;  %v210_v1 = vmul.f32 %v653_v0, %v653_v0  ;;  %432 = vset.pattern.permute.xlu1 %v535_v34  ;;  %433 = vset.pattern.permute.xlu0 %v535_v34  ;;  %v246_v35 = vld [vmem:[%s701_s1] sm:$0xf]  ;;  %v536_v42 = vmov 839922192  }
  0x2a   : > { %v247_v40 = vld [vmem:[%s702_s2] sm:$0xf]  ;;  %v258_v43 = vunpack.c.l.s4 %v536_v42 }
  0x2c   : > { %v259_v45 = vunpack.c.0.s8 %v258_v43 }
  0x30   : > { %v192_v2 = vld.sshfl [vmem:[#allocation1] sm:$0xff pattern:$0x75316420]  ;;  %v193_v3 = vld.sshfl [vmem:[#allocation1 + $0x8] sm:$0xff pattern:$0x75316420] }
  0x31   : > { %v197_v4 = vsel %vm196_vm0, %v192_v2, 0.0  ;;  %v198_v5 = vsel %vm196_vm0, %v193_v3, 0.0  ;;  %212 = vst [vmem:[#allocation1] ss:$2 sm:$0xff] %v210_v1 }
  0x32   : > { %v199_v6 = vadd.f32 %v198_v5, %v197_v4 }
  0x34   : > { %200 = vadd.xlane.f32.xlu0 %v199_v6 }
  0x38   : > { %v213_v7 = vld.sshfl [vmem:[#allocation1] sm:$0xff pattern:$0x75316420]  ;;  %v214_v8 = vld.sshfl [vmem:[#allocation1 + $0x8] sm:$0xff pattern:$0x75316420] }
  0x39   : > { %v217_v9 = vsel %vm196_vm0, %v213_v7, 0.0  ;;  %v218_v10 = vsel %vm196_vm0, %v214_v8, 0.0 }
  0x3a   : > { %v219_v11 = vadd.f32 %v218_v10, %v217_v9 }
  0x3c   : > { %220 = vadd.xlane.f32.xlu0 %v219_v11 }
  0xa7   : > { %v201_v12 = vpop.xlane.xlu0 %200 }
  0xa8   : > { %v202_v13 = vrot.slane %v201_v12, 4 }
  0xaa   : > { %v203_v14 = vadd.f32 %v202_v13, %v201_v12 }
  0xac   : > { %v204_v15 = vrot.slane %v203_v14, 2 }
  0xae   : > { %v205_v16 = vadd.f32 %v204_v15, %v203_v14 }
  0xaf   : > { %v221_v17 = vpop.xlane.xlu0 %220 }
  0xb0   : > { %v222_v18 = vrot.slane %v221_v17, 4  ;;  %v206_v19 = vrot.slane %v205_v16, 1 }
  0xb2   : > { %v223_v20 = vadd.f32 %v222_v18, %v221_v17  ;;  %v207_v21 = vadd.f32 %v206_v19, %v205_v16 }
  0xb4   : > { %v224_v22 = vrot.slane %v223_v20, 2  ;;  %377 = vpush %v207_v21 }
  0xb6   : > { %v225_v23 = vadd.f32 %v224_v22, %v223_v20 }
  0xb8   : > { %v226_v24 = vrot.slane %v225_v23, 1 }
  0xba   : > { %v227_v25 = vadd.f32 %v226_v24, %v225_v23 }
  0xbc   : > { %379 = vpush %v227_v25 }
  0xe5   : > { %s378_s23 = spop %377 }
  0xe6   : > { %s209_s4 = smul.f32 0.0009765625, %s378_s23 }
  0xe8   : > { %s230_s5 = smul.f32 %s209_s4, %s209_s4  ;;  %v250_v38 = vstv %s209_s4  ;;  %s188_s4 = scalar_lea.vmem [#allocation5], %s368_s28 }
  0xe9   : > { %s486_s28 = scalar_lea.hbm %s703_s3, 16 }
  0xed   : > { %s380_s6 = spop %379 }
  0xee   : > { %s229_s7 = smul.f32 0.0009765625, %s380_s6  ;;  %s288_s6 = sshll.u32 %s188_s4, 4  ;;  %s289_s6 = int_to_ptr.vmem [resolvable:$true] %s288_s6 }
  0xf0   : > { %s231_s8 = ssub.f32 %s229_s7, %s230_s5  ;;  %s286_s5 = scalar_lea.hbm %s703_s3, %s376_s29 }
  0xf1   : > { %s290_s7 = sshll.u32 %s286_s5, 4  ;;  %s291_s7 = int_to_ptr.hbm [resolvable:$true] %s290_s7 }
  0xf2   : > { %s232_s10 = smax.f32 %s534_s9, %s231_s8  ;;  %s275_s8 = scalar_lea.sflag [#allocation4], %s643_s26 }
  0xf3   : > { %s233_s11 = sadd.f32 1e-08, %s232_s10  ;;  %s480_s16 = sshra.s32 %s291_s7, 4  ;;  %s481_s16 = int_to_ptr.hbm [resolvable:$true] %s480_s16 }
  0xf4   : > { %s482_s9 = scalar_lea.hbm %s481_s16, 8  ;;  %p487_p0 = scmp.lt.s32.totalorder %s481_s16, %s703_s3 }
  0xf5   : > { %v234_v26 = vstv %s233_s11  ;;  %p483_p6 = scmp.ne.s32.totalorder %s481_s16, %s482_s9  ;;  %p488_p1 = scmp.lt.s32.totalorder %s486_s28, %s482_s9 }
  0xf6   : > { %434 = vrsqrt.f32 %v234_v26  ;;  %vm241_vm2 = vweird.f32 %v234_v26 }
  0xf7   : > { %p484_p9 = pnand %p483_p6, %p607_p11  ;;  %p489_p3 = por %p488_p1, %p487_p0 }
  0xf9   : > { %p485_p13 = pneg %p484_p9 }
  0xfb   : > { %p490_p4 = pnand %p489_p3, %p485_p13 }
  0xfc   : > { %v435_v27 = vpop.eup %434 }
  0xfd   : > { %v236_v28 = vmul.f32 %v435_v27, %v234_v26  ;;  %vm242_vm1 = vweird.f32 %v435_v27 }
  0xfe   : > { %vm243_vm3 = vmor %vm241_vm2, %vm242_vm1 }
  0xff   : > { %v237_v29 = vmul.f32 %v435_v27, %v236_v28 }
 0x101   : > { %v238_v30 = vmul.f32 0.5, %v237_v29 }
 0x103   : > { %v239_v31 = vsub.f32 1.5, %v238_v30 }
 0x105   : > { %v240_v32 = vmul.f32 %v435_v27, %v239_v31 }
 0x107   : > { %v244_v33 = vsel %vm243_vm3, %v435_v27, %v240_v32 }
 0x108   : > { %381 = vpush %v244_v33 }
 0x139   : > { %s382_s20 = spop %381 }
 0x13a   : > { %v248_v36 = vstv %s382_s20 }
 0x13b   : > { %v249_v37 = vmul.f32 %v248_v36, %v246_v35 }
 0x13d   : > { %255 = vperm.xlu1 %432, %v249_v37   ;;  %v251_v39 = vmul.f32 %v250_v38, %v249_v37 }
 0x13f   : > { %v252_v41 = vsub.f32 %v247_v40, %v251_v39 }
 0x145   : > { %265 = vperm.xlu1 %432, %v252_v41  }
 0x1af   : > { %v256_v44 = vpop.permute.xlu1 %255 }
 0x1b0   : > { %v260_v46 = vperm.slane %v256_v44, %v259_v45 }
 0x1b2   : > { %v262_v48 = vmul.f32 %v260_v46, %v653_v0 }
 0x1b7   : > { %v266_v47 = vpop.permute.xlu1 %265 }
 0x1b8   : > { %v270_v49 = vperm.slane %v266_v47, %v259_v45 }
 0x1ba   : > { %v272_v50 = vadd.f32 %v270_v49, %v262_v48 }
 0x1bc   : > { %273 = vst [vmem:[%s188_s4] sm:$0xff] %v272_v50 }
 0x1bd   : > { %493 = shalt.err (!%p490_p4)
}
 0x1be   : > { %385 = dma.vmem_to_hbm [thread:$0]  (%p607_p11), %s289_s6, 128, %s291_s7, %s275_s8  }
 0x1bf PF: > { %s302_s26 = sand.u32 1, %s520_s12   ;;  %p709_p7 = scmp.ge.s32.totalorder %s532_s15, 2 }
 0x1c0   : > { %s303_s20 = scalar_lea.sflag [#allocation4], %s302_s26 }
 0x1c1   : > { %p392_p5 = pnand %p709_p7, %p611_p12 }
 0x1c3   : > { %p393_p8 = pneg %p392_p5 }
 0x1c5   : > { %515 = dma.done.wait (%p393_p8), %s303_s20, 128  }
 0x1c6   : > { %517 = vsyncadd (%p393_p8), %s303_s20, 4294967168  ;;  %p16_p10 = scmp.ge.s32.totalorder %s582_s18, 4   ;;  %s710_s12 = smov %s524_s13 }
 0x1c7   : > { %s711_s13 = smov %s528_s14  ;;  %s712_s14 = smov %s594_s21 }
 0x1c8   : > { %s713_s15 = smov %s582_s18  ;;  %18 = sbr.rel (!%p16_p10) target bundleno = 5 (0x5), region = 77 }
 0x1cd   :  { %309 = vsyncpa [#allocation3], 1 }
 0x1ce   :  { %311 = vsyncpa [#allocation3 + $0x1], 1 }
 0x1cf   :  { %312 = vsyncpa [#allocation4], 1 }
 0x1d0   :  { %314 = vsyncpa [#allocation4 + $0x1], 1 }

</bundles_post_ra>
